<compile_context>
chip_gen: v7x
topology: tpu7x:2x2x1
jax: 0.10.0
libtpu: 0.0.40
codegen_flags: <defaults>
</compile_context>

<pallas_src>
import functools

import jax
import jax.numpy as jnp
from jax.experimental import pallas as pl
from jax.experimental.pallas import tpu as pltpu


def _round_up(x, m):
    return (x + m - 1) // m * m


def _default_use_bf16():
    """bf16 VPU/EUP/MXU paths exist on v6e/v7x; keep f32 on v5e and older."""
    try:
        kind = jax.devices()[0].device_kind.lower()
    except Exception:  # pragma: no cover - no devices visible
        return False
    return any(tag in kind for tag in ("v6", "v7"))


def _policy_kernel(x_ref, w1_ref, w2_ref, w3_ref, b1_ref, b2_ref, b3_ref,
                   mean_ref):
    """One batch tile: mean = tanh(tanh(x@W1+b1)@W2+b2) @ W3 + b3."""
    cdt = w1_ref.dtype  # compute dtype: bf16 on v6e/v7x, f32 on v5e

    x = x_ref[...]                                                 # [TB, S]
    z1 = (jnp.dot(x, w1_ref[...], preferred_element_type=jnp.float32)
          + b1_ref[...])                                           # [TB, H1] f32
    h1 = jnp.tanh(z1.astype(cdt))                                  # bf16 EUP on v6e/v7x
    z2 = (jnp.dot(h1, w2_ref[...], preferred_element_type=jnp.float32)
          + b2_ref[...])                                           # [TB, H2] f32
    h2 = jnp.tanh(z2.astype(cdt))
    mean = (jnp.dot(h2, w3_ref[...], preferred_element_type=jnp.float32)
            + b3_ref[...])                                         # [TB, A] f32
    mean_ref[...] = mean.astype(mean_ref.dtype)


def prepare_params(params, use_bf16=None):
    """One-time parameter prep (casts + bias row layout), outside the hot path."""
    if use_bf16 is None:
        use_bf16 = _default_use_bf16()
    cdt = jnp.bfloat16 if use_bf16 else jnp.float32
    return dict(
        w1=params["w1"].astype(cdt),
        w2=params["w2"].astype(cdt),
        w3=params["w3"].astype(cdt),
        b1=params["b1"].reshape(1, -1).astype(jnp.float32),
        b2=params["b2"].reshape(1, -1).astype(jnp.float32),
        b3=params["b3"].reshape(1, -1).astype(jnp.float32),
        log_std=params["log_std"].astype(jnp.float32),
    )


@functools.partial(jax.jit, static_argnames=("tile_b",))
def policy_forward(state, prepared, tile_b=4096):
    """Fused PolicyNetwork forward.

    Args:
      state:    f32[B, state_dim]
      prepared: output of prepare_params (weights [in, out], bias rows [1, out]).
      tile_b:   max batch rows per grid step.

    Returns:
      (mean f32[B, action_dim], std f32[action_dim])
    """
    B, S = state.shape
    H1 = prepared["w1"].shape[1]
    H2 = prepared["w2"].shape[1]
    A = prepared["w3"].shape[1]
    cdt = prepared["w1"].dtype

    # --- balanced batch tiling: waste bounded to <8 rows per tile ------------
    B8 = _round_up(B, 8)
    num_tiles = pl.cdiv(B8, tile_b)
    if B8 >= 16:
        # >=2 tiles (even count) so v7x's two TensorCores both run; harmless
        # single-TC overhead (~0.35us/step) on v5e/v6e.
        num_tiles = _round_up(max(num_tiles, 2), 2)
    TB = _round_up(pl.cdiv(B8, num_tiles), 8)
    B_pad = num_tiles * TB

    x = state.astype(cdt)
    if B_pad != B:
        # Tail padding only (<8*num_tiles rows); cheap relative to the kernel.
        x = jnp.pad(x, ((0, B_pad - B), (0, 0)))

    grid_spec = pltpu.PrefetchScalarGridSpec(
        num_scalar_prefetch=0,
        grid=(num_tiles,),
        in_specs=[
            pl.BlockSpec((TB, S), lambda i: (i, 0)),     # state tile (pipelined)
            pl.BlockSpec((S, H1), lambda i: (0, 0)),     # weights: VMEM-resident
            pl.BlockSpec((H1, H2), lambda i: (0, 0)),
            pl.BlockSpec((H2, A), lambda i: (0, 0)),
            pl.BlockSpec((1, H1), lambda i: (0, 0)),     # bias rows at exact widths
            pl.BlockSpec((1, H2), lambda i: (0, 0)),
            pl.BlockSpec((1, A), lambda i: (0, 0)),
        ],
        out_specs=pl.BlockSpec((TB, A), lambda i: (i, 0)),
    )

    mean_pad = pl.pallas_call(
        _policy_kernel,
        out_shape=jax.ShapeDtypeStruct((B_pad, A), jnp.float32),
        grid_spec=grid_spec,
        compiler_params=pltpu.CompilerParams(
            dimension_semantics=("parallel",)),  # batch tiles shard across TCs
    )(x, prepared["w1"], prepared["w2"], prepared["w3"],
      prepared["b1"], prepared["b2"], prepared["b3"])

    mean = mean_pad[:B]
    # std is state-independent -> computed once outside the per-batch kernel.
    std = jnp.exp(prepared["log_std"])
    return mean, std


def init_params(key, state_dim, action_dim, hidden_dim=(64, 64)):
    """Deterministic init mimicking nn.Linear's U(-1/sqrt(in), 1/sqrt(in))."""
    h1, h2 = hidden_dim
    ks = jax.random.split(key, 6)

    def linear(kw, kb, fan_in, fan_out):
        bound = 1.0 / jnp.sqrt(float(fan_in))
        w = jax.random.uniform(kw, (fan_in, fan_out), jnp.float32, -bound, bound)
        b = jax.random.uniform(kb, (fan_out,), jnp.float32, -bound, bound)
        return w, b

    w1, b1 = linear(ks[0], ks[1], state_dim, h1)
    w2, b2 = linear(ks[2], ks[3], h1, h2)
    w3, b3 = linear(ks[4], ks[5], h2, action_dim)
    log_std = jnp.zeros((action_dim,), jnp.float32)  # nn.Parameter(torch.zeros(A))
    return dict(w1=w1, b1=b1, w2=w2, b2=b2, w3=w3, b3=b3, log_std=log_std)


def _reference_forward(state, p):
    h1 = jnp.tanh(state @ p["w1"] + p["b1"])
    h2 = jnp.tanh(h1 @ p["w2"] + p["b2"])
    mean = h2 @ p["w3"] + p["b3"]
    std = jnp.exp(p["log_std"])
    return mean, std


if __name__ == "__main__":
    key = jax.random.PRNGKey(0)
    k_params, k_state = jax.random.split(key)

    batch = 100          # deliberately not a multiple of 8 to exercise tail padding
    state_dim = 16
    action_dim = 8
    hidden_dim = (64, 64)

    params = init_params(k_params, state_dim, action_dim, hidden_dim)
    state = jax.random.normal(k_state, (batch, state_dim), jnp.float32)

    use_bf16 = _default_use_bf16()
    prepared = prepare_params(params, use_bf16=use_bf16)

    mean, std = policy_forward(state, prepared)
    mean = jax.block_until_ready(mean)
    std = jax.block_until_ready(std)

    ref_mean, ref_std = _reference_forward(state, params)
    assert mean.shape == (batch, action_dim)
    assert std.shape == (action_dim,)
    tol = 5e-2 if use_bf16 else 1e-5  # bf16 matmul/tanh path needs looser tolerance
    assert jnp.allclose(mean, ref_mean, atol=tol, rtol=tol)
    assert jnp.allclose(std, ref_std, atol=1e-6, rtol=1e-6)

    print("KERNEL_OK")
</pallas_src>

<mosaic_0001>
module attributes {stable_mosaic.version = 11 : i64} {
  func.func @_policy_kernel(%arg0: i32, %arg1: memref<56x16xf32, #tpu.memory_space<vmem>>, %arg2: memref<16x64xf32, #tpu.memory_space<vmem>>, %arg3: memref<64x64xf32, #tpu.memory_space<vmem>>, %arg4: memref<64x8xf32, #tpu.memory_space<vmem>>, %arg5: memref<1x64xf32, #tpu.memory_space<vmem>>, %arg6: memref<1x64xf32, #tpu.memory_space<vmem>>, %arg7: memref<1x8xf32, #tpu.memory_space<vmem>>, %arg8: memref<56x8xf32, #tpu.memory_space<vmem>>) attributes {dimension_semantics = [#tpu.dimension_semantics<parallel>], iteration_bounds = array<i64: 2>, scalar_prefetch = 0 : i64, scratch_operands = 0 : i64, tpu.core_type = #tpu.core_type<tc>, window_params = [{transform_indices = @transform_0, window_bounds = array<i64: 56, 16>}, {pipeline_mode = #tpu.pipeline_mode<synchronous>, transform_indices = @transform_1, window_bounds = array<i64: 16, 64>}, {pipeline_mode = #tpu.pipeline_mode<synchronous>, transform_indices = @transform_2, window_bounds = array<i64: 64, 64>}, {pipeline_mode = #tpu.pipeline_mode<synchronous>, transform_indices = @transform_3, window_bounds = array<i64: 64, 8>}, {pipeline_mode = #tpu.pipeline_mode<synchronous>, transform_indices = @transform_4, window_bounds = array<i64: 1, 64>}, {pipeline_mode = #tpu.pipeline_mode<synchronous>, transform_indices = @transform_5, window_bounds = array<i64: 1, 64>}, {pipeline_mode = #tpu.pipeline_mode<synchronous>, transform_indices = @transform_6, window_bounds = array<i64: 1, 8>}, {transform_indices = @transform_7, window_bounds = array<i64: 56, 8>}]} {
    %c0 = arith.constant 0 : index
    %c0_0 = arith.constant 0 : index
    %0 = vector.load %arg1[%c0, %c0_0] : memref<56x16xf32, #tpu.memory_space<vmem>>, vector<56x16xf32>
    %c0_1 = arith.constant 0 : index
    %c0_2 = arith.constant 0 : index
    %1 = vector.load %arg2[%c0_1, %c0_2] : memref<16x64xf32, #tpu.memory_space<vmem>>, vector<16x64xf32>
    %cst = arith.constant dense<0.000000e+00> : vector<56x64xf32>
    %2 = tpu.matmul %0, %1, %cst {dimension_numbers = #tpu.dot_dimension_numbers<[1], [0], [0], [1], [0, 0, 1, 1], [], []>} : vector<56x16xf32>, vector<16x64xf32>, vector<56x64xf32> -> vector<56x64xf32>
    %c0_3 = arith.constant 0 : index
    %c0_4 = arith.constant 0 : index
    %3 = vector.load %arg5[%c0_3, %c0_4] : memref<1x64xf32, #tpu.memory_space<vmem>>, vector<1x64xf32>
    %4 = vector.broadcast %3 : vector<1x64xf32> to vector<56x64xf32>
    %5 = arith.addf %2, %4 : vector<56x64xf32>
    %6 = math.tanh %5 : vector<56x64xf32>
    %c0_5 = arith.constant 0 : index
    %c0_6 = arith.constant 0 : index
    %7 = vector.load %arg3[%c0_5, %c0_6] : memref<64x64xf32, #tpu.memory_space<vmem>>, vector<64x64xf32>
    %cst_7 = arith.constant dense<0.000000e+00> : vector<56x64xf32>
    %8 = tpu.matmul %6, %7, %cst_7 {dimension_numbers = #tpu.dot_dimension_numbers<[1], [0], [0], [1], [0, 0, 1, 1], [], []>} : vector<56x64xf32>, vector<64x64xf32>, vector<56x64xf32> -> vector<56x64xf32>
    %c0_8 = arith.constant 0 : index
    %c0_9 = arith.constant 0 : index
    %9 = vector.load %arg6[%c0_8, %c0_9] : memref<1x64xf32, #tpu.memory_space<vmem>>, vector<1x64xf32>
    %10 = vector.broadcast %9 : vector<1x64xf32> to vector<56x64xf32>
    %11 = arith.addf %8, %10 : vector<56x64xf32>
    %12 = math.tanh %11 : vector<56x64xf32>
    %c0_10 = arith.constant 0 : index
    %c0_11 = arith.constant 0 : index
    %13 = vector.load %arg4[%c0_10, %c0_11] : memref<64x8xf32, #tpu.memory_space<vmem>>, vector<64x8xf32>
    %cst_12 = arith.constant dense<0.000000e+00> : vector<56x8xf32>
    %14 = tpu.matmul %12, %13, %cst_12 {dimension_numbers = #tpu.dot_dimension_numbers<[1], [0], [0], [1], [0, 0, 1, 1], [], []>} : vector<56x64xf32>, vector<64x8xf32>, vector<56x8xf32> -> vector<56x8xf32>
    %c0_13 = arith.constant 0 : index
    %c0_14 = arith.constant 0 : index
    %15 = vector.load %arg7[%c0_13, %c0_14] : memref<1x8xf32, #tpu.memory_space<vmem>>, vector<1x8xf32>
    %16 = vector.broadcast %15 : vector<1x8xf32> to vector<56x8xf32>
    %17 = arith.addf %14, %16 : vector<56x8xf32>
    %c0_15 = arith.constant 0 : index
    %c0_16 = arith.constant 0 : index
    %18 = vector.load %arg8[%c0_15, %c0_16] : memref<56x8xf32, #tpu.memory_space<vmem>>, vector<56x8xf32>
    tpu.vector_store %arg8[%c0_15, %c0_16], %17 {strides = array<i32>} : memref<56x8xf32, #tpu.memory_space<vmem>>, vector<56x8xf32>,
    return
  }
  func.func @transform_0(%arg0: i32) -> (i32, i32) {
    %c0_i32 = arith.constant 0 : i32
    %c0_i32_0 = arith.constant 0 : i32
    return %arg0, %c0_i32 : i32, i32
  }
  func.func @transform_1(%arg0: i32) -> (i32, i32) {
    %c0_i32 = arith.constant 0 : i32
    %c0_i32_0 = arith.constant 0 : i32
    %c0_i32_1 = arith.constant 0 : i32
    return %c0_i32, %c0_i32_0 : i32, i32
  }
  func.func @transform_2(%arg0: i32) -> (i32, i32) {
    %c0_i32 = arith.constant 0 : i32
    %c0_i32_0 = arith.constant 0 : i32
    %c0_i32_1 = arith.constant 0 : i32
    return %c0_i32, %c0_i32_0 : i32, i32
  }
  func.func @transform_3(%arg0: i32) -> (i32, i32) {
    %c0_i32 = arith.constant 0 : i32
    %c0_i32_0 = arith.constant 0 : i32
    %c0_i32_1 = arith.constant 0 : i32
    return %c0_i32, %c0_i32_0 : i32, i32
  }
  func.func @transform_4(%arg0: i32) -> (i32, i32) {
    %c0_i32 = arith.constant 0 : i32
    %c0_i32_0 = arith.constant 0 : i32
    %c0_i32_1 = arith.constant 0 : i32
    return %c0_i32, %c0_i32_0 : i32, i32
  }
  func.func @transform_5(%arg0: i32) -> (i32, i32) {
    %c0_i32 = arith.constant 0 : i32
    %c0_i32_0 = arith.constant 0 : i32
    %c0_i32_1 = arith.constant 0 : i32
    return %c0_i32, %c0_i32_0 : i32, i32
  }
  func.func @transform_6(%arg0: i32) -> (i32, i32) {
    %c0_i32 = arith.constant 0 : i32
    %c0_i32_0 = arith.constant 0 : i32
    %c0_i32_1 = arith.constant 0 : i32
    return %c0_i32, %c0_i32_0 : i32, i32
  }
  func.func @transform_7(%arg0: i32) -> (i32, i32) {
    %c0_i32 = arith.constant 0 : i32
    %c0_i32_0 = arith.constant 0 : i32
    return %arg0, %c0_i32 : i32, i32
  }
}

</mosaic_0001>

<bundles_post_ra>
// kernel: policy_forward.1
= control target key start
LH: loop header
LB: loop body
LE: loop exit
PB: predicated region body
PF: predicated region fallthrough
CT: control target
= control target key end

     0   :  { %s1061_s24 = smov 0   ;;  %s1228_s0 = inlined_call_operand.vmem [shape: f32[112,16], index: 0, kind: input, shape index: {}]   ;;  %s1229_s1 = inlined_call_operand.vmem [shape: f32[16,64], index: 1, kind: input, shape index: {}]   ;;  %s1230_s2 = inlined_call_operand.vmem [shape: f32[64,64], index: 2, kind: input, shape index: {}]   ;;  %s1231_s3 = inlined_call_operand.vmem [shape: f32[64,8], index: 3, kind: input, shape index: {}]   ;;  %s1232_s4 = inlined_call_operand.vmem [shape: f32[1,64], index: 4, kind: input, shape index: {}]   ;;  %s1233_s5 = inlined_call_operand.vmem [shape: f32[1,64], index: 5, kind: input, shape index: {}]   ;;  %s1234_s6 = inlined_call_operand.vmem [shape: f32[1,8], index: 6, kind: input, shape index: {}]   ;;  %s1235_s7 = inlined_call_operand.vmem [shape: f32[112,8], index: 7, kind: output, shape index: {}]  }
   0x1 LB: > { %s771_s25 = sadd.s32 4294967295, %s1016_s24   ;;  %p775_p0 = scmp.ge.s32.totalorder %s1016_s24, 1  ;;  %s1016_s24 = sphi %s1061_s24, %s17_s24  }
   0x2   : > { %p238_p1 = scmp.lt.s32.totalorder %s1016_s24, 3 }
   0x4   : > { %p239_p2 = pnand %p775_p0, %p238_p1 }
   0x5   : > { %v289_v0 = vld [vmem:[%s1229_s1] sm:$0xff] (!%p239_p2)  ;;  %v290_v1 = vld [vmem:[%s1229_s1 + $0x8] sm:$0xff] (!%p239_p2)  ;;  %s270_s30 = smul.u32 (!%p239_p2), 7, %s771_s25  ;;  %v1018_v2 = vmov (!%p239_p2), 0.0|0.0   ;;  %vm1019_vm0 = vmmov (!%p239_p2), 0   ;;  %v1020_v4 = vmov (!%p239_p2), 0.0  }
   0x6   : > { %242 = sbr.rel (%p239_p2) target bundleno = 706 (0x2c2), region = 48  ;;  %942 = vmatprep.subr.bf16.mxu0 (!%p239_p2), %v1018_v2  ;;  %v943_v3 = vpack.c.bf16 (!%p239_p2), %v290_v1, %v289_v0  ;;  %847 = vmatprep.mubr.msk.f32.mxu0 (!%p239_p2), %vm1019_vm0, %v1020_v4  ;;  %v427_v5 = vld [vmem:[%s1230_s2] sm:$0xff] (!%p239_p2)  ;;  %v428_v6 = vld [vmem:[%s1230_s2 + $0x8] sm:$0xff] (!%p239_p2)  ;;  %vm298_vm1 = vcmask (!%p239_p2), 130048   ;;  %v429_v15 = vld [vmem:[%s1230_s2 + $0x10] sm:$0xff] (!%p239_p2)  ;;  %vm442_vm2 = vcmask (!%p239_p2), 523264  }
   0x7   : > { %p271_p3 = scmp.lt.s32.totalorder (!%p239_p2), %s270_s30, 13  ;;  %969 = vmatprep.subr.bf16.mxu1 (!%p239_p2), %v1018_v2  ;;  %859 = vmatprep.mubr.msk.f32.mxu1 (!%p239_p2), %vm1019_vm0, %v1020_v4  ;;  %v946_v7 = vpack.c.bf16 (!%p239_p2), %v428_v6, %v427_v5  ;;  %v430_v16 = vld [vmem:[%s1230_s2 + $0x18] sm:$0xff] (!%p239_p2)  ;;  %v431_v18 = vld [vmem:[%s1230_s2 + $0x20] sm:$0xff] (!%p239_p2)  ;;  %v432_v19 = vld [vmem:[%s1230_s2 + $0x28] sm:$0xff] (!%p239_p2)  ;;  %vm707_vm3 = vcmask (!%p239_p2), 64512  }
   0x8   : > { %944 = vmatpush3.bf16.msra.mxu0 (!%p239_p2), %v943_v3  ;;  %970 = vmatpush3.bf16.msra.mxu1 (!%p239_p2), %v943_v3  ;;  %v949_v17 = vpack.c.bf16 (!%p239_p2), %v430_v16, %v429_v15  ;;  %v952_v20 = vpack.c.bf16 (!%p239_p2), %v432_v19, %v431_v18  ;;  %v433_v21 = vld [vmem:[%s1230_s2 + $0x30] sm:$0xff] (!%p239_p2)  ;;  %v434_v22 = vld [vmem:[%s1230_s2 + $0x38] sm:$0xff] (!%p239_p2)  ;;  %v571_v24 = vld [vmem:[%s1231_s3] sm:$0xff] (!%p239_p2) }
   0x9   : > { %945 = vmatprep.subr.bf16.mxu1 (!%p239_p2), %v1018_v2  ;;  %957 = vmatprep.subr.bf16.mxu0 (!%p239_p2), %v1018_v2  ;;  %v955_v23 = vpack.c.bf16 (!%p239_p2), %v434_v22, %v433_v21  ;;  %v572_v25 = vld [vmem:[%s1231_s3 + $0x8] sm:$0xff] (!%p239_p2)  ;;  %v778_v27 = vld [vmem:[%s1232_s4] ss:$0 sm:$0xff] (!%p239_p2)  ;;  %v573_v56 = vld [vmem:[%s1231_s3 + $0x10] sm:$0xff] (!%p239_p2) }
   0xa   : > { %v958_v26 = vpack.c.bf16 (!%p239_p2), %v572_v25, %v571_v24  ;;  %v574_v57 = vld [vmem:[%s1231_s3 + $0x18] sm:$0xff] (!%p239_p2)  ;;  %v575_v59 = vld [vmem:[%s1231_s3 + $0x20] sm:$0xff] (!%p239_p2)  ;;  %v576_v60 = vld [vmem:[%s1231_s3 + $0x28] sm:$0xff] (!%p239_p2) }
   0xb   : > { %v961_v58 = vpack.c.bf16 (!%p239_p2), %v574_v57, %v573_v56  ;;  %v964_v61 = vpack.c.bf16 (!%p239_p2), %v576_v60, %v575_v59  ;;  %v577_v62 = vld [vmem:[%s1231_s3 + $0x30] sm:$0xff] (!%p239_p2)  ;;  %v578_v63 = vld [vmem:[%s1231_s3 + $0x38] sm:$0xff] (!%p239_p2)  ;;  %v786_v1 = vld [vmem:[%s1233_s5] ss:$0 sm:$0xff] (!%p239_p2) }
   0xc   : > { %v967_v0 = vpack.c.bf16 (!%p239_p2), %v578_v63, %v577_v62 }
   0xd   : > { %s1237_s30 = smov (!%p271_p3, %s270_s30), 13 }
   0xe   : > { %s776_s12 = sshll.u32 %s1237_s30, 3 }
   0xf   : > { %s274_s15 = scalar_lea.vmem %s1228_s0, %s776_s12  ;;  %s280_s11 = scalar_lea.vmem %s1235_s7, %s776_s12 }
  0x10   : > { %v282_v8 = vld [vmem:[%s274_s15] sm:$0xff]  ;;  %v283_v10 = vld [vmem:[%s274_s15 + $0x8] sm:$0xff]  ;;  %v284_v12 = vld [vmem:[%s274_s15 + $0x10] sm:$0xff] }
  0x11   : > { %848 = vmatmul.mubr.msk.f32.vlgmr.msra.gmra.mrb[0].mxu0 %vm298_vm1, %v282_v8  ;;  %v286_v9 = vld [vmem:[%s274_s15 + $0x20] sm:$0xff]  ;;  %v287_v11 = vld [vmem:[%s274_s15 + $0x28] sm:$0xff]  ;;  %v288_v13 = vld [vmem:[%s274_s15 + $0x30] sm:$0xff] }
  0x12   : > { %850 = vmatprep.mubr.msk.f32.mxu0 %vm1019_vm0, %v1020_v4  ;;  %860 = vmatmul.mubr.msk.f32.vlgmr.msra.gmra.mrb[0].mxu1 %vm298_vm1, %v286_v9  ;;  %v285_v14 = vld [vmem:[%s274_s15 + $0x18] sm:$0xff] }
  0x13   : > { %862 = vmatprep.mubr.msk.f32.mxu1 %vm1019_vm0, %v1020_v4  ;;  %947 = vmatpush3.bf16.msra.mxu1 %v946_v7 }
  0x14   : > { %948 = vmatprep.subr.bf16.mxu1 %v1018_v2  ;;  %959 = vmatpush3.bf16.msra.mxu0 %v958_v26 }
  0x15   : > { %851 = vmatmul.mubr.msk.f32.gmra.mrb[2].mxu0 %vm298_vm1, %v283_v10  ;;  %960 = vmatprep.subr.bf16.mxu0 %v1018_v2 }
  0x16   : > { %853 = vmatprep.mubr.msk.f32.mxu0 %vm1019_vm0, %v1020_v4  ;;  %863 = vmatmul.mubr.msk.f32.gmra.mrb[2].mxu1 %vm298_vm1, %v287_v11 }
  0x17   : > { %865 = vmatprep.mubr.msk.f32.mxu1 %vm1019_vm0, %v1020_v4  ;;  %950 = vmatpush3.bf16.msra.mxu1 %v949_v17 }
  0x18   : > { %951 = vmatprep.subr.bf16.mxu1 %v1018_v2  ;;  %962 = vmatpush3.bf16.msra.mxu0 %v961_v58 }
  0x19   : > { %854 = vmatmul.mubr.msk.f32.gmra.mrb[4].mxu0 %vm298_vm1, %v284_v12  ;;  %963 = vmatprep.subr.bf16.mxu0 %v1018_v2 }
  0x1a   : > { %856 = vmatprep.mubr.msk.f32.mxu0 %vm1019_vm0, %v1020_v4  ;;  %866 = vmatmul.mubr.msk.f32.gmra.mrb[4].mxu1 %vm298_vm1, %v288_v13 }
  0x1b   : > { %884 = vmatprep.mubr.msk.f32.mxu1 %vm1019_vm0, %v1020_v4  ;;  %953 = vmatpush3.bf16.msra.mxu1 %v952_v20 }
  0x1c   : > { %954 = vmatprep.subr.bf16.mxu1 %v1018_v2  ;;  %965 = vmatpush3.bf16.msra.mxu0 %v964_v61 }
  0x1d   : > { %857 = vmatmul.mubr.msk.f32.gmra.mrb[6].mxu0 %vm298_vm1, %v285_v14  ;;  %966 = vmatprep.subr.bf16.mxu0 %v1018_v2 }
  0x1e   : > { %921 = vmatprep.mubr.msk.f32.mxu0 %vm1019_vm0, %v1020_v4 }
  0x1f   : > { %956 = vmatpush3.bf16.msra.mxu1 %v955_v23 }
  0x20   : > { %968 = vmatpush3.bf16.msra.mxu0 %v967_v0 }
  0xe4   : > { %v386_v28 = vpop.f32.mrb[0].mxu0 }
  0xe5   : > { %v387_v29 = vadd.f32 %v778_v27, %v386_v28  ;;  %v849_v30 = vpop.f32.mrb[1].mxu0  ;;  %v406_v31 = vpop.f32.mrb[0].mxu1 }
  0xe6   : > { %v861_v32 = vpop.f32.mrb[1].mxu1  ;;  %v407_v47 = vadd.f32 %v778_v27, %v406_v31  ;;  %v794_v31 = vld [vmem:[%s1234_s6] ss:$0 sm:$0xff] }
  0xe7   : > { %982 = vtanh.f32 %v387_v29 }
  0xe8   : > { %v391_v33 = vpop.f32.mrb[2].mxu0 }
  0xe9   : > { %v392_v34 = vadd.f32 %v778_v27, %v391_v33  ;;  %v852_v35 = vpop.f32.mrb[3].mxu0  ;;  %v411_v36 = vpop.f32.mrb[2].mxu1 }
  0xea   : > { %v864_v37 = vpop.f32.mrb[3].mxu1  ;;  %v412_v49 = vadd.f32 %v778_v27, %v411_v36 }
  0xeb   : > { %984 = vtanh.f32 %v392_v34 }
  0xec   : > { %v396_v38 = vpop.f32.mrb[4].mxu0 }
  0xed   : > { %v397_v39 = vadd.f32 %v778_v27, %v396_v38  ;;  %v855_v40 = vpop.f32.mrb[5].mxu0  ;;  %v416_v41 = vpop.f32.mrb[4].mxu1 }
  0xee   : > { %v867_v42 = vpop.f32.mrb[5].mxu1  ;;  %v417_v51 = vadd.f32 %v778_v27, %v416_v41 }
  0xef   : > { %986 = vtanh.f32 %v397_v39 }
  0xf0   : > { %v401_v43 = vpop.f32.mrb[6].mxu0 }
  0xf1   : > { %v983_v44 = vpop.eup %982  ;;  %v402_v45 = vadd.f32 %v778_v27, %v401_v43  ;;  %v858_v46 = vpop.f32.mrb[7].mxu0 }
  0xf2   : > { %885 = vmatmul.mubr.msk.f32.vlgmr.msra.gmra.mrb[6].mxu1 %vm442_vm2, %v983_v44 }
  0xf3   : > { %988 = vtanh.f32 %v402_v45  ;;  %887 = vmatprep.mubr.msk.f32.mxu1 %vm1019_vm0, %v1020_v4 }
  0xf4   : > { %990 = vtanh.f32 %v407_v47 }
  0xf5   : > { %v985_v48 = vpop.eup %984  ;;  %992 = vtanh.f32 %v412_v49 }
  0xf6   : > { %888 = vmatmul.mubr.msk.f32.gmra.mrb[8].mxu1 %vm442_vm2, %v985_v48  ;;  %994 = vtanh.f32 %v417_v51 }
  0xf7   : > { %890 = vmatprep.mubr.msk.f32.mxu1 %vm1019_vm0, %v1020_v4 }
  0xf9   : > { %v987_v50 = vpop.eup %986 }
  0xfa   : > { %891 = vmatmul.mubr.msk.f32.gmra.mrb[10].mxu1 %vm442_vm2, %v987_v50 }
  0xfb   : > { %893 = vmatprep.mubr.msk.f32.mxu1 %vm1019_vm0, %v1020_v4 }
  0xfd   : > { %v989_v52 = vpop.eup %988 }
  0xfe   : > { %894 = vmatmul.mubr.msk.f32.gmra.mrb[12].mxu1 %vm442_vm2, %v989_v52  ;;  %v991_v53 = vpop.eup %990 }
  0xff   : > { %896 = vmatprep.mubr.msk.f32.mxu1 %vm1019_vm0, %v1020_v4  ;;  %v993_v54 = vpop.eup %992 }
 0x100   : > { %v995_v55 = vpop.eup %994 }
 0x102   : > { %897 = vmatmul.mubr.msk.f32.gmra.mrb[14].mxu1 %vm442_vm2, %v991_v53 }
 0x103   : > { %899 = vmatprep.mubr.msk.f32.mxu1 %vm1019_vm0, %v1020_v4 }
 0x106   : > { %900 = vmatmul.mubr.msk.f32.gmra.mrb[16].mxu1 %vm442_vm2, %v993_v54 }
 0x107   : > { %902 = vmatprep.mubr.msk.f32.mxu1 %vm1019_vm0, %v1020_v4 }
 0x10a   : > { %903 = vmatmul.mubr.msk.f32.gmra.mrb[18].mxu1 %vm442_vm2, %v995_v55 }
 0x1c5   : > { %v530_v3 = vpop.f32.mrb[6].mxu1 }
 0x1c6   : > { %v531_v5 = vadd.f32 %v786_v1, %v530_v3  ;;  %v886_v6 = vpop.f32.mrb[7].mxu1 }
 0x1c8   : > { %996 = vtanh.f32 %v531_v5 }
 0x1c9   : > { %v535_v7 = vpop.f32.mrb[8].mxu1 }
 0x1ca   : > { %v536_v2 = vadd.f32 %v786_v1, %v535_v7  ;;  %v889_v8 = vpop.f32.mrb[9].mxu1 }
 0x1cc   : > { %998 = vtanh.f32 %v536_v2 }
 0x1cd   : > { %v540_v9 = vpop.f32.mrb[10].mxu1 }
 0x1ce   : > { %v541_v10 = vadd.f32 %v786_v1, %v540_v9  ;;  %v892_v11 = vpop.f32.mrb[11].mxu1 }
 0x1d0   : > { %1000 = vtanh.f32 %v541_v10 }
 0x1d1   : > { %v545_v12 = vpop.f32.mrb[12].mxu1 }
 0x1d2   : > { %v997_v13 = vpop.eup %996  ;;  %v546_v14 = vadd.f32 %v786_v1, %v545_v12  ;;  %v895_v15 = vpop.f32.mrb[13].mxu1 }
 0x1d3   : > { %922 = vmatmul.mubr.msk.f32.vlgmr.msra.gmra.mrb[8].mxu0 %vm442_vm2, %v997_v13 }
 0x1d4   : > { %1002 = vtanh.f32 %v546_v14  ;;  %924 = vmatprep.mubr.msk.f32.mxu0 %vm1019_vm0, %v1020_v4 }
 0x1d5   : > { %v550_v16 = vpop.f32.mrb[14].mxu1 }
 0x1d6   : > { %v999_v17 = vpop.eup %998  ;;  %v551_v18 = vadd.f32 %v786_v1, %v550_v16  ;;  %v898_v19 = vpop.f32.mrb[15].mxu1 }
 0x1d7   : > { %925 = vmatmul.mubr.msk.f32.gmra.mrb[10].mxu0 %vm442_vm2, %v999_v17 }
 0x1d8   : > { %1004 = vtanh.f32 %v551_v18  ;;  %927 = vmatprep.mubr.msk.f32.mxu0 %vm1019_vm0, %v1020_v4 }
 0x1d9   : > { %v555_v20 = vpop.f32.mrb[16].mxu1 }
 0x1da   : > { %v1001_v21 = vpop.eup %1000  ;;  %v556_v22 = vadd.f32 %v786_v1, %v555_v20  ;;  %v901_v23 = vpop.f32.mrb[17].mxu1 }
 0x1db   : > { %928 = vmatmul.mubr.msk.f32.gmra.mrb[12].mxu0 %vm442_vm2, %v1001_v21 }
 0x1dc   : > { %1006 = vtanh.f32 %v556_v22  ;;  %930 = vmatprep.mubr.msk.f32.mxu0 %vm1019_vm0, %v1020_v4 }
 0x1dd   : > { %v560_v24 = vpop.f32.mrb[18].mxu1 }
 0x1de   : > { %v1003_v25 = vpop.eup %1002  ;;  %v561_v26 = vadd.f32 %v786_v1, %v560_v24  ;;  %v904_v27 = vpop.f32.mrb[19].mxu1 }
 0x1df   : > { %931 = vmatmul.mubr.msk.f32.gmra.mrb[14].mxu0 %vm442_vm2, %v1003_v25 }
 0x1e0   : > { %1008 = vtanh.f32 %v561_v26  ;;  %933 = vmatprep.mubr.msk.f32.mxu0 %vm1019_vm0, %v1020_v4 }
 0x1e2   : > { %v1005_v28 = vpop.eup %1004 }
 0x1e3   : > { %934 = vmatmul.mubr.msk.f32.gmra.mrb[16].mxu0 %vm442_vm2, %v1005_v28 }
 0x1e4   : > { %936 = vmatprep.mubr.msk.f32.mxu0 %vm1019_vm0, %v1020_v4 }
 0x1e6   : > { %v1007_v29 = vpop.eup %1006 }
 0x1e7   : > { %937 = vmatmul.mubr.msk.f32.gmra.mrb[18].mxu0 %vm442_vm2, %v1007_v29 }
 0x1e8   : > { %939 = vmatprep.mubr.msk.f32.mxu0 %vm1019_vm0, %v1020_v4 }
 0x1ea   : > { %v1009_v30 = vpop.eup %1008 }
 0x1eb   : > { %940 = vmatmul.mubr.msk.f32.gmra.mrb[20].mxu0 %vm442_vm2, %v1009_v30 }
 0x2a6   : > { %v673_v32 = vpop.f32.mrb[8].mxu0 }
 0x2a7   : > { %v674_v33 = vadd.f32 %v794_v31, %v673_v32  ;;  %v923_v34 = vpop.f32.mrb[9].mxu0 }
 0x2a9   : > { %708 = vst.msk [vmem:[%s280_s11] sm:$0xff] %vm707_vm3, %v674_v33 }
 0x2aa   : > { %v678_v35 = vpop.f32.mrb[10].mxu0 }
 0x2ab   : > { %v679_v4 = vadd.f32 %v794_v31, %v678_v35  ;;  %v926_v36 = vpop.f32.mrb[11].mxu0 }
 0x2ad   : > { %709 = vst.msk [vmem:[%s280_s11 + $0x8] sm:$0xff] %vm707_vm3, %v679_v4 }
 0x2ae   : > { %v683_v37 = vpop.f32.mrb[12].mxu0 }
 0x2af   : > { %v684_v38 = vadd.f32 %v794_v31, %v683_v37  ;;  %v929_v39 = vpop.f32.mrb[13].mxu0 }
 0x2b1   : > { %710 = vst.msk [vmem:[%s280_s11 + $0x10] sm:$0xff] %vm707_vm3, %v684_v38 }
 0x2b2   : > { %v688_v40 = vpop.f32.mrb[14].mxu0 }
 0x2b3   : > { %v689_v41 = vadd.f32 %v794_v31, %v688_v40  ;;  %v932_v42 = vpop.f32.mrb[15].mxu0 }
 0x2b5   : > { %711 = vst.msk [vmem:[%s280_s11 + $0x18] sm:$0xff] %vm707_vm3, %v689_v41 }
 0x2b6   : > { %v693_v43 = vpop.f32.mrb[16].mxu0 }
 0x2b7   : > { %v694_v44 = vadd.f32 %v794_v31, %v693_v43  ;;  %v935_v45 = vpop.f32.mrb[17].mxu0 }
 0x2b9   : > { %712 = vst.msk [vmem:[%s280_s11 + $0x20] sm:$0xff] %vm707_vm3, %v694_v44 }
 0x2ba   : > { %v698_v46 = vpop.f32.mrb[18].mxu0 }
 0x2bb   : > { %v699_v47 = vadd.f32 %v794_v31, %v698_v46  ;;  %v938_v48 = vpop.f32.mrb[19].mxu0 }
 0x2bd   : > { %713 = vst.msk [vmem:[%s280_s11 + $0x28] sm:$0xff] %vm707_vm3, %v699_v47 }
 0x2be   : > { %v703_v49 = vpop.f32.mrb[20].mxu0 }
 0x2bf   : > { %v704_v50 = vadd.f32 %v794_v31, %v703_v49  ;;  %v941_v51 = vpop.f32.mrb[21].mxu0 }
 0x2c1   : > { %714 = vst.msk [vmem:[%s280_s11 + $0x30] sm:$0xff] %vm707_vm3, %v704_v50 }
 0x2c2 PF: > { %s17_s24 = sadd.s32 1, %s1016_s24  }
 0x2c3   : > { %p14_p4 = scmp.ge.s32.totalorder %s17_s24, 4  }
 0x2c5   :  { %16 = sbr.rel (!%p14_p4) target bundleno = 1 (0x1), region = 78 }

</bundles_post_ra>
